<compile_context>
chip_gen: v7x
topology: tpu7x:2x2x1
jax: 0.10.0
libtpu: 0.0.40
codegen_flags: <defaults>
</compile_context>

<pallas_src>
import math
import functools

import jax
import jax.numpy as jnp
from jax import lax
from jax.experimental import pallas as pl
from jax.experimental.pallas import tpu as pltpu

EPS = 1e-6  # RMSNorm eps


# --------------------------------------------------------------------------- helpers
def _vmem_capacity_bytes() -> int:
    try:
        return int(pltpu.get_tpu_info().vmem_capacity_bytes)
    except Exception:
        return 64 << 20  # conservative fallback: v7x per-TensorCore VMEM


def _clamp_vmem(estimate_bytes: int, cap_bytes: int) -> int:
    hi = cap_bytes - (2 << 20)  # keep headroom below physical VMEM
    return int(min(hi, max(estimate_bytes, 32 << 20)))


def _pick_ffn_chunk(ffn_dim: int, attn_dim: int) -> int:
    """Largest F-divisor chunk whose streamed, double-buffered bf16 weight tiles
    ((D,2c) gate|up + (c,D) down ~= 12*D*c bytes) stay within ~24 MiB of VMEM."""
    budget = 24 << 20
    for c in (4096, 2048, 1024, 512, 256, 128):
        if ffn_dim % c == 0 and 12 * attn_dim * c <= budget:
            return c
    return ffn_dim  # tiny F: single chunk


# --------------------------------------------------------------------------- kernels
def _attn_kernel(x_ref, cos_ref, sins_ref, wqkvh_ref, woh_ref, g1_ref,
                 out_ref, xn_s, acc_s, *, head_dim: int, use_roll: bool):
    """One (batch, head) grid step: norm1 (at h==0) -> per-head QKV projection,
    value-level RoPE, causal softmax, PV, and accumulation of o_h @ wo_h; the
    attention residual is written at the last head."""
    h = pl.program_id(1)
    T, D = xn_s.shape
    half = head_dim // 2

    @pl.when(h == 0)
    def _():
        x = x_ref[0]                                                 # (T, D) f32
        var = jnp.mean(x * x, axis=-1, keepdims=True)
        xn_s[...] = (x * lax.rsqrt(var + EPS) * g1_ref[...]).astype(jnp.bfloat16)
        acc_s[...] = jnp.zeros_like(acc_s)

    xn = xn_s[...]                                                   # (T, D) bf16
    # per-head fused q|k|v projection (bf16 MXU operands, f32 accumulation)
    qkv = jnp.dot(xn, wqkvh_ref[0], preferred_element_type=jnp.float32)   # (T, 3*hd)
    q = qkv[:, :head_dim]
    k = qkv[:, head_dim:2 * head_dim]
    v = qkv[:, 2 * head_dim:].astype(jnp.bfloat16)                   # early bf16 narrowing

    cos = cos_ref[0]                                                 # (T, hd)
    sin_s = sins_ref[0]                                              # sin, first half negated

    if use_roll:
        def swap_halves(u):                                          # cat(u2, u1) on the XLU
            return pltpu.roll(u, half, axis=1)
    else:
        # head_dim not a multiple of 128: do the half-swap as an exact permutation
        # matmul on the MXU (no unaligned lane shuffles, no scratch round trip).
        ri = lax.broadcasted_iota(jnp.int32, (head_dim, head_dim), 0)
        ci = lax.broadcasted_iota(jnp.int32, (head_dim, head_dim), 1)
        p_swap = (ri == jnp.where(ci < half, ci + half, ci - half)).astype(jnp.float32)

        def swap_halves(u):
            return jnp.dot(u, p_swap, preferred_element_type=jnp.float32)

    def rope(u):  # u*cos + rotate_half(u)*sin  (sign of rotate_half folded into sin_s)
        return u * cos + swap_halves(u) * sin_s

    scale = 1.0 / math.sqrt(head_dim)
    qe = (rope(q) * scale).astype(jnp.bfloat16)                      # fold 1/sqrt(hd) into q
    ke = rope(k).astype(jnp.bfloat16)

    # single K=head_dim score matmul for this head
    s = lax.dot_general(qe, ke, (((1,), (1,)), ((), ())),
                        preferred_element_type=jnp.float32)          # (T, T)
    row = lax.broadcasted_iota(jnp.int32, (T, T), 0)
    col = lax.broadcasted_iota(jnp.int32, (T, T), 1)
    s = jnp.where(col > row, jnp.float32(-10000.0), s)               # torch masked_fill semantics

    m = jnp.max(s, axis=-1, keepdims=True)
    p = jnp.exp(s - m)
    inv = pl.reciprocal(jnp.sum(p, axis=-1, keepdims=True), approx=True)
    p = (p * inv).astype(jnp.bfloat16)

    o_h = jnp.dot(p, v, preferred_element_type=jnp.float32).astype(jnp.bfloat16)   # (T, hd)
    # per-head slice of the output projection, accumulated in f32
    acc_s[...] += jnp.dot(o_h, woh_ref[0], preferred_element_type=jnp.float32)     # (T, D)

    @pl.when(h == pl.num_programs(1) - 1)
    def _():
        out_ref[0] = x_ref[0] + acc_s[...]                           # attention residual


def _ffn_kernel(x1_ref, g2_ref, wgu_ref, wd_ref, out_ref, xn_s, acc_s, *, chunk: int):
    """One (batch, f-chunk) grid step: norm2 (at f==0), fused gate|up matmul on the
    streamed (D, 2*chunk) tile, SwiGLU, streamed (chunk, D) down-proj accumulated in
    f32; FFN residual written at the last chunk."""
    f = pl.program_id(1)

    @pl.when(f == 0)
    def _():
        x1 = x1_ref[0]                                               # (T, D) f32
        var = jnp.mean(x1 * x1, axis=-1, keepdims=True)
        xn_s[...] = (x1 * lax.rsqrt(var + EPS) * g2_ref[...]).astype(jnp.bfloat16)
        acc_s[...] = jnp.zeros_like(acc_s)

    xn = xn_s[...]                                                   # (T, D) bf16
    gu = jnp.dot(xn, wgu_ref[0], preferred_element_type=jnp.float32)  # (T, 2*chunk)
    g = gu[:, :chunk]
    u = gu[:, chunk:]
    act = (g * jax.nn.sigmoid(g) * u).astype(jnp.bfloat16)           # SiLU(g) * u
    acc_s[...] += jnp.dot(act, wd_ref[0], preferred_element_type=jnp.float32)

    @pl.when(f == pl.num_programs(1) - 1)
    def _():
        out_ref[0] = x1_ref[0] + acc_s[...]                          # FFN residual


# --------------------------------------------------------------------------- wrapper
def get_cos_sin(maxlen: int, head_dim: int, base: float = 10000.0):
    assert head_dim % 2 == 0
    theta = 1.0 / (base ** (jnp.arange(0, head_dim, 2, dtype=jnp.float32) / head_dim))
    pos = jnp.arange(maxlen, dtype=jnp.float32)[:, None]
    ang = pos * theta[None, :]
    cos = jnp.tile(jnp.cos(ang), (1, 2))                             # (maxlen, head_dim)
    sin = jnp.tile(jnp.sin(ang), (1, 2))
    return cos, sin


def init_params(key, attn_dim: int, ffn_dim: int):
    ks = jax.random.split(key, 7)
    scale = 0.02
    return {
        "wq": scale * jax.random.normal(ks[0], (attn_dim, attn_dim), jnp.float32),
        "wk": scale * jax.random.normal(ks[1], (attn_dim, attn_dim), jnp.float32),
        "wv": scale * jax.random.normal(ks[2], (attn_dim, attn_dim), jnp.float32),
        "wo": scale * jax.random.normal(ks[3], (attn_dim, attn_dim), jnp.float32),
        "wg": scale * jax.random.normal(ks[4], (attn_dim, ffn_dim), jnp.float32),
        "wu": scale * jax.random.normal(ks[5], (attn_dim, ffn_dim), jnp.float32),
        "wd": scale * jax.random.normal(ks[6], (ffn_dim, attn_dim), jnp.float32),
        "g1": jnp.ones((1, attn_dim), jnp.float32),                  # RMSNorm weights
        "g2": jnp.ones((1, attn_dim), jnp.float32),
    }


@functools.partial(jax.jit, static_argnames=("num_heads",))
def decoder_layer(x, position_ids, params, cos_table, sin_table, *, num_heads: int):
    B, T, D = x.shape
    head_dim = D // num_heads
    half = head_dim // 2
    F = params["wg"].shape[1]
    vmem_cap = _vmem_capacity_bytes()

    # cos/sin gather in plain JAX glue; fold rotate_half's sign into sin once here.
    cos = cos_table[position_ids].astype(jnp.float32)                # (B, T, hd)
    sin = sin_table[position_ids].astype(jnp.float32)
    sign = jnp.concatenate([-jnp.ones((half,), jnp.float32),
                            jnp.ones((half,), jnp.float32)])
    sin_signed = sin * sign

    # per-head interleaved q|k|v weights: (num_heads, D, 3*head_dim), streamed per head
    def split_heads(w):  # (D, D) -> (D, num_heads, head_dim)
        return w.reshape(D, num_heads, head_dim)
    wqkv_h = jnp.concatenate([split_heads(params["wq"]),
                              split_heads(params["wk"]),
                              split_heads(params["wv"])], axis=-1)   # (D, nh, 3hd)
    wqkv_h = jnp.transpose(wqkv_h, (1, 0, 2)).astype(jnp.bfloat16)   # (nh, D, 3hd)
    wo_h = params["wo"].reshape(num_heads, head_dim, D).astype(jnp.bfloat16)
    g1 = params["g1"].astype(jnp.float32)
    g2 = params["g2"].astype(jnp.float32)

    # ---------------- attention + residual: grid = (B, num_heads) ----------------
    attn_kernel = functools.partial(_attn_kernel, head_dim=head_dim,
                                    use_roll=(head_dim % 128 == 0))
    attn_vmem = (22 * T * D + 64 * T * head_dim + 16 * D * head_dim
                 + 12 * T * T + 4 * head_dim * head_dim + 8 * D + (4 << 20))
    x1 = pl.pallas_call(
        attn_kernel,
        out_shape=jax.ShapeDtypeStruct((B, T, D), jnp.float32),
        grid_spec=pltpu.PrefetchScalarGridSpec(
            num_scalar_prefetch=0,
            grid=(B, num_heads),
            in_specs=[
                pl.BlockSpec((1, T, D), lambda b, h: (b, 0, 0)),            # x (resident over h)
                pl.BlockSpec((1, T, head_dim), lambda b, h: (b, 0, 0)),     # cos
                pl.BlockSpec((1, T, head_dim), lambda b, h: (b, 0, 0)),     # sin_signed
                pl.BlockSpec((1, D, 3 * head_dim), lambda b, h: (h, 0, 0)), # streamed per-head wqkv
                pl.BlockSpec((1, head_dim, D), lambda b, h: (h, 0, 0)),     # streamed per-head wo
                pl.BlockSpec((1, D), lambda b, h: (0, 0)),                  # g1
            ],
            out_specs=pl.BlockSpec((1, T, D), lambda b, h: (b, 0, 0)),
            scratch_shapes=[
                pltpu.VMEM((T, D), jnp.bfloat16),   # norm1 output (computed once per batch)
                pltpu.VMEM((T, D), jnp.float32),    # attention-output accumulator
            ]),
        compiler_params=pltpu.CompilerParams(
            dimension_semantics=("parallel", "arbitrary"),
            vmem_limit_bytes=_clamp_vmem(attn_vmem, vmem_cap)),
    )(x, cos, sin_signed, wqkv_h, wo_h, g1)

    # ---------------- SwiGLU FFN + residual: grid = (B, F // chunk) ----------------
    chunk = _pick_ffn_chunk(F, D)
    n_chunks = F // chunk
    # gate|up interleaved per chunk -> one contiguous DMA and one fused matmul per tile
    wgu_c = jnp.concatenate([params["wg"].reshape(D, n_chunks, chunk),
                             params["wu"].reshape(D, n_chunks, chunk)], axis=-1)
    wgu_c = jnp.transpose(wgu_c, (1, 0, 2)).astype(jnp.bfloat16)     # (nc, D, 2*chunk)
    wd_c = params["wd"].reshape(n_chunks, chunk, D).astype(jnp.bfloat16)

    ffn_kernel = functools.partial(_ffn_kernel, chunk=chunk)
    ffn_vmem = (30 * T * D + 12 * D * chunk + 20 * T * chunk + 8 * D + (4 << 20))
    out = pl.pallas_call(
        ffn_kernel,
        out_shape=jax.ShapeDtypeStruct((B, T, D), jnp.float32),
        grid_spec=pltpu.PrefetchScalarGridSpec(
            num_scalar_prefetch=0,
            grid=(B, n_chunks),
            in_specs=[
                pl.BlockSpec((1, T, D), lambda b, f: (b, 0, 0)),            # x1 (resident over f)
                pl.BlockSpec((1, D), lambda b, f: (0, 0)),                  # g2
                pl.BlockSpec((1, D, 2 * chunk), lambda b, f: (f, 0, 0)),    # streamed gate|up tile
                pl.BlockSpec((1, chunk, D), lambda b, f: (f, 0, 0)),        # streamed down tile
            ],
            out_specs=pl.BlockSpec((1, T, D), lambda b, f: (b, 0, 0)),
            scratch_shapes=[
                pltpu.VMEM((T, D), jnp.bfloat16),   # norm2 output (computed once per batch)
                pltpu.VMEM((T, D), jnp.float32),    # FFN accumulator
            ]),
        compiler_params=pltpu.CompilerParams(
            dimension_semantics=("parallel", "arbitrary"),
            vmem_limit_bytes=_clamp_vmem(ffn_vmem, vmem_cap)),
    )(x1, g2, wgu_c, wd_c)

    return out


# ---------------- pure-JAX reference (for validation) ----------------
def _ref_decoder_layer(x, position_ids, params, cos_table, sin_table, num_heads):
    B, T, D = x.shape
    hd = D // num_heads
    cos = cos_table[position_ids][:, None, :, :]   # (B,1,T,hd)
    sin = sin_table[position_ids][:, None, :, :]

    def rmsnorm(v, w):
        return v * lax.rsqrt(jnp.mean(v * v, axis=-1, keepdims=True) + EPS) * w[0]

    def rotate_half(v):
        return jnp.concatenate([-v[..., hd // 2:], v[..., :hd // 2]], axis=-1)

    xn = rmsnorm(x, params["g1"])
    q = (xn @ params["wq"]).reshape(B, T, num_heads, hd).transpose(0, 2, 1, 3)
    k = (xn @ params["wk"]).reshape(B, T, num_heads, hd).transpose(0, 2, 1, 3)
    v = (xn @ params["wv"]).reshape(B, T, num_heads, hd).transpose(0, 2, 1, 3)
    q = q * cos + rotate_half(q) * sin
    k = k * cos + rotate_half(k) * sin
    s = jnp.einsum("bntd,bnsd->bnts", q, k) / math.sqrt(hd)
    mask = jnp.triu(jnp.ones((T, T), bool), k=1)[None, None]
    s = jnp.where(mask, -10000.0, s)
    p = jax.nn.softmax(s, axis=-1)
    o = jnp.einsum("bnts,bnsd->bntd", p, v).transpose(0, 2, 1, 3).reshape(B, T, D)
    x1 = x + o @ params["wo"]

    xn2 = rmsnorm(x1, params["g2"])
    g = xn2 @ params["wg"]
    u = xn2 @ params["wu"]
    return x1 + (jax.nn.silu(g) * u) @ params["wd"]


if __name__ == "__main__":
    B, T = 2, 8
    attn_dim, ffn_dim, num_heads = 32, 64, 4
    maxlen, rope_theta = 32, 10000.0
    head_dim = attn_dim // num_heads

    key = jax.random.PRNGKey(0)
    kx, kp = jax.random.split(key)
    x = jax.random.normal(kx, (B, T, attn_dim), jnp.float32)
    position_ids = jnp.tile(jnp.arange(T, dtype=jnp.int32), (B, 1))
    params = init_params(kp, attn_dim, ffn_dim)
    cos_table, sin_table = get_cos_sin(maxlen, head_dim, rope_theta)

    out = decoder_layer(x, position_ids, params, cos_table, sin_table,
                        num_heads=num_heads)
    out = jax.block_until_ready(out)

    ref = _ref_decoder_layer(x, position_ids, params, cos_table, sin_table, num_heads)
    assert out.shape == (B, T, attn_dim)
    # bf16 MXU operands (f32 accumulation) + approx reciprocal -> loose tolerance
    assert jnp.allclose(out, ref, atol=2e-2, rtol=2e-2), "mismatch vs reference"

    print("KERNEL_OK")
</pallas_src>

<mosaic_0001>
module attributes {stable_mosaic.version = 11 : i64} {
  func.func @_attn_kernel(%arg0: i32, %arg1: i32, %arg2: memref<1x8x32xf32, #tpu.memory_space<vmem>>, %arg3: memref<1x8x8xf32, #tpu.memory_space<vmem>>, %arg4: memref<1x8x8xf32, #tpu.memory_space<vmem>>, %arg5: memref<1x32x24xbf16, #tpu.memory_space<vmem>>, %arg6: memref<1x8x32xbf16, #tpu.memory_space<vmem>>, %arg7: memref<1x32xf32, #tpu.memory_space<vmem>>, %arg8: memref<1x8x32xf32, #tpu.memory_space<vmem>>, %arg9: memref<8x32xbf16, #tpu.memory_space<vmem>>, %arg10: memref<8x32xf32, #tpu.memory_space<vmem>>) attributes {dimension_semantics = [#tpu.dimension_semantics<parallel>, #tpu.dimension_semantics<arbitrary>], iteration_bounds = array<i64: 2, 4>, scalar_prefetch = 0 : i64, scratch_operands = 2 : i64, tpu.core_type = #tpu.core_type<tc>, window_params = [{transform_indices = @transform_0, window_bounds = array<i64: 1, 8, 32>}, {transform_indices = @transform_1, window_bounds = array<i64: 1, 8, 8>}, {transform_indices = @transform_2, window_bounds = array<i64: 1, 8, 8>}, {transform_indices = @transform_3, window_bounds = array<i64: 1, 32, 24>}, {transform_indices = @transform_4, window_bounds = array<i64: 1, 8, 32>}, {pipeline_mode = #tpu.pipeline_mode<synchronous>, transform_indices = @transform_5, window_bounds = array<i64: 1, 32>}, {transform_indices = @transform_6, window_bounds = array<i64: 1, 8, 32>}]} {
    %c0_i32 = arith.constant 0 : i32
    %0 = arith.cmpi eq, %arg1, %c0_i32 : i32
    %1 = arith.extui %0 : i1 to i32
    %c0_i32_0 = arith.constant 0 : i32
    %2 = arith.cmpi ne, %1, %c0_i32_0 : i32
    scf.if %2 {
      %c0_30 = arith.constant 0 : index
      %c0_31 = arith.constant 0 : index
      %c0_32 = arith.constant 0 : index
      %67 = vector.load %arg2[%c0_30, %c0_31, %c0_32] : memref<1x8x32xf32, #tpu.memory_space<vmem>>, vector<1x8x32xf32>
      %68 = vector.shape_cast %67 : vector<1x8x32xf32> to vector<8x32xf32>
      %69 = arith.mulf %68, %68 : vector<8x32xf32>
      %cst_33 = arith.constant dense<0.000000e+00> : vector<8xf32>
      %70 = vector.multi_reduction <add>, %69, %cst_33 [1] : vector<8x32xf32> to vector<8xf32>
      %71 = vector.shape_cast %70 : vector<8xf32> to vector<8x1xf32>
      %cst_34 = arith.constant 3.200000e+01 : f32
      %72 = vector.broadcast %cst_34 : f32 to vector<8x1xf32>
      %73 = arith.divf %71, %72 : vector<8x1xf32>
      %cst_35 = arith.constant 9.99999997E-7 : f32
      %74 = vector.broadcast %cst_35 : f32 to vector<8x1xf32>
      %75 = arith.addf %73, %74 : vector<8x1xf32>
      %76 = math.rsqrt %75 : vector<8x1xf32>
      %77 = vector.broadcast %76 : vector<8x1xf32> to vector<8x32xf32>
      %78 = arith.mulf %68, %77 : vector<8x32xf32>
      %c0_36 = arith.constant 0 : index
      %c0_37 = arith.constant 0 : index
      %79 = vector.load %arg7[%c0_36, %c0_37] : memref<1x32xf32, #tpu.memory_space<vmem>>, vector<1x32xf32>
      %80 = vector.broadcast %79 : vector<1x32xf32> to vector<8x32xf32>
      %81 = arith.mulf %78, %80 : vector<8x32xf32>
      %82 = arith.truncf %81 : vector<8x32xf32> to vector<8x32xbf16>
      %c0_38 = arith.constant 0 : index
      %c0_39 = arith.constant 0 : index
      %83 = vector.load %arg9[%c0_38, %c0_39] : memref<8x32xbf16, #tpu.memory_space<vmem>>, vector<8x32xbf16>
      tpu.vector_store %arg9[%c0_38, %c0_39], %82 {strides = array<i32>} : memref<8x32xbf16, #tpu.memory_space<vmem>>, vector<8x32xbf16>,
      %cst_40 = arith.constant 0.000000e+00 : f32
      %84 = vector.broadcast %cst_40 : f32 to vector<8x32xf32>
      %c0_41 = arith.constant 0 : index
      %c0_42 = arith.constant 0 : index
      %85 = vector.load %arg10[%c0_41, %c0_42] : memref<8x32xf32, #tpu.memory_space<vmem>>, vector<8x32xf32>
      tpu.vector_store %arg10[%c0_41, %c0_42], %84 {strides = array<i32>} : memref<8x32xf32, #tpu.memory_space<vmem>>, vector<8x32xf32>,
    } else {
    }
    %c0 = arith.constant 0 : index
    %c0_1 = arith.constant 0 : index
    %3 = vector.load %arg9[%c0, %c0_1] : memref<8x32xbf16, #tpu.memory_space<vmem>>, vector<8x32xbf16>
    %c0_2 = arith.constant 0 : index
    %c0_3 = arith.constant 0 : index
    %c0_4 = arith.constant 0 : index
    %4 = vector.load %arg5[%c0_2, %c0_3, %c0_4] : memref<1x32x24xbf16, #tpu.memory_space<vmem>>, vector<1x32x24xbf16>
    %5 = vector.shape_cast %4 : vector<1x32x24xbf16> to vector<32x24xbf16>
    %cst = arith.constant dense<0.000000e+00> : vector<8x24xf32>
    %6 = tpu.matmul %3, %5, %cst {dimension_numbers = #tpu.dot_dimension_numbers<[1], [0], [0], [1], [0, 0, 1, 1], [], []>} : vector<8x32xbf16>, vector<32x24xbf16>, vector<8x24xf32> -> vector<8x24xf32>
    %7 = vector.extract_strided_slice %6 {offsets = [0, 0], sizes = [8, 8], strides = [1, 1]} : vector<8x24xf32> to vector<8x8xf32>
    %8 = vector.extract_strided_slice %6 {offsets = [0, 8], sizes = [8, 8], strides = [1, 1]} : vector<8x24xf32> to vector<8x8xf32>
    %9 = vector.extract_strided_slice %6 {offsets = [0, 16], sizes = [8, 8], strides = [1, 1]} : vector<8x24xf32> to vector<8x8xf32>
    %10 = arith.truncf %9 : vector<8x8xf32> to vector<8x8xbf16>
    %c0_5 = arith.constant 0 : index
    %c0_6 = arith.constant 0 : index
    %c0_7 = arith.constant 0 : index
    %11 = vector.load %arg3[%c0_5, %c0_6, %c0_7] : memref<1x8x8xf32, #tpu.memory_space<vmem>>, vector<1x8x8xf32>
    %12 = vector.shape_cast %11 : vector<1x8x8xf32> to vector<8x8xf32>
    %c0_8 = arith.constant 0 : index
    %c0_9 = arith.constant 0 : index
    %c0_10 = arith.constant 0 : index
    %13 = vector.load %arg4[%c0_8, %c0_9, %c0_10] : memref<1x8x8xf32, #tpu.memory_space<vmem>>, vector<1x8x8xf32>
    %14 = vector.shape_cast %13 : vector<1x8x8xf32> to vector<8x8xf32>
    %15 = tpu.iota {dimensions = array<i32: 0>} : vector<8x8xi32>
    %16 = tpu.iota {dimensions = array<i32: 1>} : vector<8x8xi32>
    %c4_i32 = arith.constant 4 : i32
    %17 = vector.broadcast %c4_i32 : i32 to vector<8x8xi32>
    %18 = arith.cmpi slt, %16, %17 : vector<8x8xi32>
    %c4_i32_11 = arith.constant 4 : i32
    %19 = vector.broadcast %c4_i32_11 : i32 to vector<8x8xi32>
    %20 = arith.addi %16, %19 : vector<8x8xi32>
    %c4_i32_12 = arith.constant 4 : i32
    %21 = vector.broadcast %c4_i32_12 : i32 to vector<8x8xi32>
    %22 = arith.subi %16, %21 : vector<8x8xi32>
    %23 = arith.select %18, %20, %22 : vector<8x8xi1>, vector<8x8xi32>
    %24 = arith.cmpi eq, %15, %23 : vector<8x8xi32>
    %25 = arith.extui %24 : vector<8x8xi1> to vector<8x8xi32>
    %26 = arith.sitofp %25 : vector<8x8xi32> to vector<8x8xf32>
    %27 = arith.mulf %7, %12 : vector<8x8xf32>
    %cst_13 = arith.constant dense<0.000000e+00> : vector<8x8xf32>
    %28 = tpu.matmul %7, %26, %cst_13 {dimension_numbers = #tpu.dot_dimension_numbers<[1], [0], [0], [1], [0, 0, 1, 1], [], []>} : vector<8x8xf32>, vector<8x8xf32>, vector<8x8xf32> -> vector<8x8xf32>
    %29 = arith.mulf %28, %14 : vector<8x8xf32>
    %30 = arith.addf %27, %29 : vector<8x8xf32>
    %cst_14 = arith.constant 0.353553385 : f32
    %31 = vector.broadcast %cst_14 : f32 to vector<8x8xf32>
    %32 = arith.mulf %30, %31 : vector<8x8xf32>
    %33 = arith.truncf %32 : vector<8x8xf32> to vector<8x8xbf16>
    %34 = arith.mulf %8, %12 : vector<8x8xf32>
    %cst_15 = arith.constant dense<0.000000e+00> : vector<8x8xf32>
    %35 = tpu.matmul %8, %26, %cst_15 {dimension_numbers = #tpu.dot_dimension_numbers<[1], [0], [0], [1], [0, 0, 1, 1], [], []>} : vector<8x8xf32>, vector<8x8xf32>, vector<8x8xf32> -> vector<8x8xf32>
    %36 = arith.mulf %35, %14 : vector<8x8xf32>
    %37 = arith.addf %34, %36 : vector<8x8xf32>
    %38 = arith.truncf %37 : vector<8x8xf32> to vector<8x8xbf16>
    %cst_16 = arith.constant dense<0.000000e+00> : vector<8x8xf32>
    %39 = tpu.matmul %33, %38, %cst_16 {dimension_numbers = #tpu.dot_dimension_numbers<[1], [1], [0], [0], [0, 0, 1, 0], [], []>} : vector<8x8xbf16>, vector<8x8xbf16>, vector<8x8xf32> -> vector<8x8xf32>
    %40 = tpu.iota {dimensions = array<i32: 0>} : vector<8x8xi32>
    %41 = tpu.iota {dimensions = array<i32: 1>} : vector<8x8xi32>
    %42 = arith.cmpi sgt, %41, %40 : vector<8x8xi32>
    %cst_17 = arith.constant -1.000000e+04 : f32
    %43 = vector.broadcast %cst_17 : f32 to vector<8x8xf32>
    %44 = arith.select %42, %43, %39 : vector<8x8xi1>, vector<8x8xf32>
    %cst_18 = arith.constant dense<0xFF800000> : vector<8xf32>
    %45 = vector.multi_reduction <maximumf>, %44, %cst_18 [1] : vector<8x8xf32> to vector<8xf32>
    %46 = vector.shape_cast %45 : vector<8xf32> to vector<8x1xf32>
    %47 = vector.broadcast %46 : vector<8x1xf32> to vector<8x8xf32>
    %48 = arith.subf %44, %47 : vector<8x8xf32>
    %49 = math.exp %48 : vector<8x8xf32>
    %cst_19 = arith.constant dense<0.000000e+00> : vector<8xf32>
    %50 = vector.multi_reduction <add>, %49, %cst_19 [1] : vector<8x8xf32> to vector<8xf32>
    %51 = vector.shape_cast %50 : vector<8xf32> to vector<8x1xf32>
    %52 = tpu.reciprocal %51 {approx = true} : vector<8x1xf32> -> vector<8x1xf32>
    %53 = vector.broadcast %52 : vector<8x1xf32> to vector<8x8xf32>
    %54 = arith.mulf %49, %53 : vector<8x8xf32>
    %55 = arith.truncf %54 : vector<8x8xf32> to vector<8x8xbf16>
    %cst_20 = arith.constant dense<0.000000e+00> : vector<8x8xf32>
    %56 = tpu.matmul %55, %10, %cst_20 {dimension_numbers = #tpu.dot_dimension_numbers<[1], [0], [0], [1], [0, 0, 1, 1], [], []>} : vector<8x8xbf16>, vector<8x8xbf16>, vector<8x8xf32> -> vector<8x8xf32>
    %57 = arith.truncf %56 : vector<8x8xf32> to vector<8x8xbf16>
    %c0_21 = arith.constant 0 : index
    %c0_22 = arith.constant 0 : index
    %58 = vector.load %arg10[%c0_21, %c0_22] : memref<8x32xf32, #tpu.memory_space<vmem>>, vector<8x32xf32>
    %c0_23 = arith.constant 0 : index
    %c0_24 = arith.constant 0 : index
    %c0_25 = arith.constant 0 : index
    %59 = vector.load %arg6[%c0_23, %c0_24, %c0_25] : memref<1x8x32xbf16, #tpu.memory_space<vmem>>, vector<1x8x32xbf16>
    %60 = vector.shape_cast %59 : vector<1x8x32xbf16> to vector<8x32xbf16>
    %cst_26 = arith.constant dense<0.000000e+00> : vector<8x32xf32>
    %61 = tpu.matmul %57, %60, %cst_26 {dimension_numbers = #tpu.dot_dimension_numbers<[1], [0], [0], [1], [0, 0, 1, 1], [], []>} : vector<8x8xbf16>, vector<8x32xbf16>, vector<8x32xf32> -> vector<8x32xf32>
    %62 = arith.addf %58, %61 : vector<8x32xf32>
    %c0_27 = arith.constant 0 : index
    %c0_28 = arith.constant 0 : index
    %63 = vector.load %arg10[%c0_27, %c0_28] : memref<8x32xf32, #tpu.memory_space<vmem>>, vector<8x32xf32>
    tpu.vector_store %arg10[%c0_27, %c0_28], %62 {strides = array<i32>} : memref<8x32xf32, #tpu.memory_space<vmem>>, vector<8x32xf32>,
    %c3_i32 = arith.constant 3 : i32
    %64 = arith.cmpi eq, %arg1, %c3_i32 : i32
    %65 = arith.extui %64 : i1 to i32
    %c0_i32_29 = arith.constant 0 : i32
    %66 = arith.cmpi ne, %65, %c0_i32_29 : i32
    scf.if %66 {
      %c0_30 = arith.constant 0 : index
      %c0_31 = arith.constant 0 : index
      %c0_32 = arith.constant 0 : index
      %67 = vector.load %arg2[%c0_30, %c0_31, %c0_32] : memref<1x8x32xf32, #tpu.memory_space<vmem>>, vector<1x8x32xf32>
      %68 = vector.shape_cast %67 : vector<1x8x32xf32> to vector<8x32xf32>
      %c0_33 = arith.constant 0 : index
      %c0_34 = arith.constant 0 : index
      %69 = vector.load %arg10[%c0_33, %c0_34] : memref<8x32xf32, #tpu.memory_space<vmem>>, vector<8x32xf32>
      %70 = arith.addf %68, %69 : vector<8x32xf32>
      %c0_35 = arith.constant 0 : index
      %c0_36 = arith.constant 0 : index
      %c0_37 = arith.constant 0 : index
      %71 = vector.load %arg8[%c0_35, %c0_36, %c0_37] : memref<1x8x32xf32, #tpu.memory_space<vmem>>, vector<1x8x32xf32>
      %72 = vector.shape_cast %71 : vector<1x8x32xf32> to vector<8x32xf32>
      %73 = vector.shape_cast %70 : vector<8x32xf32> to vector<1x8x32xf32>
      tpu.vector_store %arg8[%c0_35, %c0_36, %c0_37], %73 {strides = array<i32>} : memref<1x8x32xf32, #tpu.memory_space<vmem>>, vector<1x8x32xf32>,
    } else {
    }
    return
  }
  func.func @transform_0(%arg0: i32, %arg1: i32) -> (i32, i32, i32) {
    %c0_i32 = arith.constant 0 : i32
    %c0_i32_0 = arith.constant 0 : i32
    %c0_i32_1 = arith.constant 0 : i32
    return %arg0, %c0_i32, %c0_i32_0 : i32, i32, i32
  }
  func.func @transform_1(%arg0: i32, %arg1: i32) -> (i32, i32, i32) {
    %c0_i32 = arith.constant 0 : i32
    %c0_i32_0 = arith.constant 0 : i32
    %c0_i32_1 = arith.constant 0 : i32
    return %arg0, %c0_i32, %c0_i32_0 : i32, i32, i32
  }
  func.func @transform_2(%arg0: i32, %arg1: i32) -> (i32, i32, i32) {
    %c0_i32 = arith.constant 0 : i32
    %c0_i32_0 = arith.constant 0 : i32
    %c0_i32_1 = arith.constant 0 : i32
    return %arg0, %c0_i32, %c0_i32_0 : i32, i32, i32
  }
  func.func @transform_3(%arg0: i32, %arg1: i32) -> (i32, i32, i32) {
    %c0_i32 = arith.constant 0 : i32
    %c0_i32_0 = arith.constant 0 : i32
    %c0_i32_1 = arith.constant 0 : i32
    return %arg1, %c0_i32, %c0_i32_0 : i32, i32, i32
  }
  func.func @transform_4(%arg0: i32, %arg1: i32) -> (i32, i32, i32) {
    %c0_i32 = arith.constant 0 : i32
    %c0_i32_0 = arith.constant 0 : i32
    %c0_i32_1 = arith.constant 0 : i32
    return %arg1, %c0_i32, %c0_i32_0 : i32, i32, i32
  }
  func.func @transform_5(%arg0: i32, %arg1: i32) -> (i32, i32) {
    %c0_i32 = arith.constant 0 : i32
    %c0_i32_0 = arith.constant 0 : i32
    %c0_i32_1 = arith.constant 0 : i32
    return %c0_i32, %c0_i32_0 : i32, i32
  }
  func.func @transform_6(%arg0: i32, %arg1: i32) -> (i32, i32, i32) {
    %c0_i32 = arith.constant 0 : i32
    %c0_i32_0 = arith.constant 0 : i32
    %c0_i32_1 = arith.constant 0 : i32
    return %arg0, %c0_i32, %c0_i32_0 : i32, i32, i32
  }
}

module attributes {stable_mosaic.version = 11 : i64} {
  func.func @_ffn_kernel(%arg0: i32, %arg1: i32, %arg2: memref<1x8x32xf32, #tpu.memory_space<vmem>>, %arg3: memref<1x32xf32, #tpu.memory_space<vmem>>, %arg4: memref<1x32x128xbf16, #tpu.memory_space<vmem>>, %arg5: memref<1x64x32xbf16, #tpu.memory_space<vmem>>, %arg6: memref<1x8x32xf32, #tpu.memory_space<vmem>>, %arg7: memref<8x32xbf16, #tpu.memory_space<vmem>>, %arg8: memref<8x32xf32, #tpu.memory_space<vmem>>) attributes {dimension_semantics = [#tpu.dimension_semantics<parallel>, #tpu.dimension_semantics<arbitrary>], iteration_bounds = array<i64: 2, 1>, scalar_prefetch = 0 : i64, scratch_operands = 2 : i64, tpu.core_type = #tpu.core_type<tc>, window_params = [{transform_indices = @transform_0, window_bounds = array<i64: 1, 8, 32>}, {pipeline_mode = #tpu.pipeline_mode<synchronous>, transform_indices = @transform_1, window_bounds = array<i64: 1, 32>}, {transform_indices = @transform_2, window_bounds = array<i64: 1, 32, 128>}, {transform_indices = @transform_3, window_bounds = array<i64: 1, 64, 32>}, {transform_indices = @transform_4, window_bounds = array<i64: 1, 8, 32>}]} {
    %c0_i32 = arith.constant 0 : i32
    %0 = arith.cmpi eq, %arg1, %c0_i32 : i32
    %1 = arith.extui %0 : i1 to i32
    %c0_i32_0 = arith.constant 0 : i32
    %2 = arith.cmpi ne, %1, %c0_i32_0 : i32
    scf.if %2 {
      %c0_16 = arith.constant 0 : index
      %c0_17 = arith.constant 0 : index
      %c0_18 = arith.constant 0 : index
      %26 = vector.load %arg2[%c0_16, %c0_17, %c0_18] : memref<1x8x32xf32, #tpu.memory_space<vmem>>, vector<1x8x32xf32>
      %27 = vector.shape_cast %26 : vector<1x8x32xf32> to vector<8x32xf32>
      %28 = arith.mulf %27, %27 : vector<8x32xf32>
      %cst_19 = arith.constant dense<0.000000e+00> : vector<8xf32>
      %29 = vector.multi_reduction <add>, %28, %cst_19 [1] : vector<8x32xf32> to vector<8xf32>
      %30 = vector.shape_cast %29 : vector<8xf32> to vector<8x1xf32>
      %cst_20 = arith.constant 3.200000e+01 : f32
      %31 = vector.broadcast %cst_20 : f32 to vector<8x1xf32>
      %32 = arith.divf %30, %31 : vector<8x1xf32>
      %cst_21 = arith.constant 9.99999997E-7 : f32
      %33 = vector.broadcast %cst_21 : f32 to vector<8x1xf32>
      %34 = arith.addf %32, %33 : vector<8x1xf32>
      %35 = math.rsqrt %34 : vector<8x1xf32>
      %36 = vector.broadcast %35 : vector<8x1xf32> to vector<8x32xf32>
      %37 = arith.mulf %27, %36 : vector<8x32xf32>
      %c0_22 = arith.constant 0 : index
      %c0_23 = arith.constant 0 : index
      %38 = vector.load %arg3[%c0_22, %c0_23] : memref<1x32xf32, #tpu.memory_space<vmem>>, vector<1x32xf32>
      %39 = vector.broadcast %38 : vector<1x32xf32> to vector<8x32xf32>
      %40 = arith.mulf %37, %39 : vector<8x32xf32>
      %41 = arith.truncf %40 : vector<8x32xf32> to vector<8x32xbf16>
      %c0_24 = arith.constant 0 : index
      %c0_25 = arith.constant 0 : index
      %42 = vector.load %arg7[%c0_24, %c0_25] : memref<8x32xbf16, #tpu.memory_space<vmem>>, vector<8x32xbf16>
      tpu.vector_store %arg7[%c0_24, %c0_25], %41 {strides = array<i32>} : memref<8x32xbf16, #tpu.memory_space<vmem>>, vector<8x32xbf16>,
      %cst_26 = arith.constant 0.000000e+00 : f32
      %43 = vector.broadcast %cst_26 : f32 to vector<8x32xf32>
      %c0_27 = arith.constant 0 : index
      %c0_28 = arith.constant 0 : index
      %44 = vector.load %arg8[%c0_27, %c0_28] : memref<8x32xf32, #tpu.memory_space<vmem>>, vector<8x32xf32>
      tpu.vector_store %arg8[%c0_27, %c0_28], %43 {strides = array<i32>} : memref<8x32xf32, #tpu.memory_space<vmem>>, vector<8x32xf32>,
    } else {
    }
    %c0 = arith.constant 0 : index
    %c0_1 = arith.constant 0 : index
    %3 = vector.load %arg7[%c0, %c0_1] : memref<8x32xbf16, #tpu.memory_space<vmem>>, vector<8x32xbf16>
    %c0_2 = arith.constant 0 : index
    %c0_3 = arith.constant 0 : index
    %c0_4 = arith.constant 0 : index
    %4 = vector.load %arg4[%c0_2, %c0_3, %c0_4] : memref<1x32x128xbf16, #tpu.memory_space<vmem>>, vector<1x32x128xbf16>
    %5 = vector.shape_cast %4 : vector<1x32x128xbf16> to vector<32x128xbf16>
    %cst = arith.constant dense<0.000000e+00> : vector<8x128xf32>
    %6 = tpu.matmul %3, %5, %cst {dimension_numbers = #tpu.dot_dimension_numbers<[1], [0], [0], [1], [0, 0, 1, 1], [], []>} : vector<8x32xbf16>, vector<32x128xbf16>, vector<8x128xf32> -> vector<8x128xf32>
    %7 = vector.extract_strided_slice %6 {offsets = [0, 0], sizes = [8, 64], strides = [1, 1]} : vector<8x128xf32> to vector<8x64xf32>
    %8 = vector.extract_strided_slice %6 {offsets = [0, 64], sizes = [8, 64], strides = [1, 1]} : vector<8x128xf32> to vector<8x64xf32>
    %9 = arith.negf %7 : vector<8x64xf32>
    %10 = math.exp %9 : vector<8x64xf32>
    %cst_5 = arith.constant 1.000000e+00 : f32
    %11 = vector.broadcast %cst_5 : f32 to vector<8x64xf32>
    %12 = arith.addf %11, %10 : vector<8x64xf32>
    %13 = arith.divf %11, %12 : vector<8x64xf32>
    %14 = arith.mulf %7, %13 : vector<8x64xf32>
    %15 = arith.mulf %14, %8 : vector<8x64xf32>
    %16 = arith.truncf %15 : vector<8x64xf32> to vector<8x64xbf16>
    %c0_6 = arith.constant 0 : index
    %c0_7 = arith.constant 0 : index
    %17 = vector.load %arg8[%c0_6, %c0_7] : memref<8x32xf32, #tpu.memory_space<vmem>>, vector<8x32xf32>
    %c0_8 = arith.constant 0 : index
    %c0_9 = arith.constant 0 : index
    %c0_10 = arith.constant 0 : index
    %18 = vector.load %arg5[%c0_8, %c0_9, %c0_10] : memref<1x64x32xbf16, #tpu.memory_space<vmem>>, vector<1x64x32xbf16>
    %19 = vector.shape_cast %18 : vector<1x64x32xbf16> to vector<64x32xbf16>
    %cst_11 = arith.constant dense<0.000000e+00> : vector<8x32xf32>
    %20 = tpu.matmul %16, %19, %cst_11 {dimension_numbers = #tpu.dot_dimension_numbers<[1], [0], [0], [1], [0, 0, 1, 1], [], []>} : vector<8x64xbf16>, vector<64x32xbf16>, vector<8x32xf32> -> vector<8x32xf32>
    %21 = arith.addf %17, %20 : vector<8x32xf32>
    %c0_12 = arith.constant 0 : index
    %c0_13 = arith.constant 0 : index
    %22 = vector.load %arg8[%c0_12, %c0_13] : memref<8x32xf32, #tpu.memory_space<vmem>>, vector<8x32xf32>
    tpu.vector_store %arg8[%c0_12, %c0_13], %21 {strides = array<i32>} : memref<8x32xf32, #tpu.memory_space<vmem>>, vector<8x32xf32>,
    %c0_i32_14 = arith.constant 0 : i32
    %23 = arith.cmpi eq, %arg1, %c0_i32_14 : i32
    %24 = arith.extui %23 : i1 to i32
    %c0_i32_15 = arith.constant 0 : i32
    %25 = arith.cmpi ne, %24, %c0_i32_15 : i32
    scf.if %25 {
      %c0_16 = arith.constant 0 : index
      %c0_17 = arith.constant 0 : index
      %c0_18 = arith.constant 0 : index
      %26 = vector.load %arg2[%c0_16, %c0_17, %c0_18] : memref<1x8x32xf32, #tpu.memory_space<vmem>>, vector<1x8x32xf32>
      %27 = vector.shape_cast %26 : vector<1x8x32xf32> to vector<8x32xf32>
      %c0_19 = arith.constant 0 : index
      %c0_20 = arith.constant 0 : index
      %28 = vector.load %arg8[%c0_19, %c0_20] : memref<8x32xf32, #tpu.memory_space<vmem>>, vector<8x32xf32>
      %29 = arith.addf %27, %28 : vector<8x32xf32>
      %c0_21 = arith.constant 0 : index
      %c0_22 = arith.constant 0 : index
      %c0_23 = arith.constant 0 : index
      %30 = vector.load %arg6[%c0_21, %c0_22, %c0_23] : memref<1x8x32xf32, #tpu.memory_space<vmem>>, vector<1x8x32xf32>
      %31 = vector.shape_cast %30 : vector<1x8x32xf32> to vector<8x32xf32>
      %32 = vector.shape_cast %29 : vector<8x32xf32> to vector<1x8x32xf32>
      tpu.vector_store %arg6[%c0_21, %c0_22, %c0_23], %32 {strides = array<i32>} : memref<1x8x32xf32, #tpu.memory_space<vmem>>, vector<1x8x32xf32>,
    } else {
    }
    return
  }
  func.func @transform_0(%arg0: i32, %arg1: i32) -> (i32, i32, i32) {
    %c0_i32 = arith.constant 0 : i32
    %c0_i32_0 = arith.constant 0 : i32
    %c0_i32_1 = arith.constant 0 : i32
    return %arg0, %c0_i32, %c0_i32_0 : i32, i32, i32
  }
  func.func @transform_1(%arg0: i32, %arg1: i32) -> (i32, i32) {
    %c0_i32 = arith.constant 0 : i32
    %c0_i32_0 = arith.constant 0 : i32
    %c0_i32_1 = arith.constant 0 : i32
    return %c0_i32, %c0_i32_0 : i32, i32
  }
  func.func @transform_2(%arg0: i32, %arg1: i32) -> (i32, i32, i32) {
    %c0_i32 = arith.constant 0 : i32
    %c0_i32_0 = arith.constant 0 : i32
    %c0_i32_1 = arith.constant 0 : i32
    return %arg1, %c0_i32, %c0_i32_0 : i32, i32, i32
  }
  func.func @transform_3(%arg0: i32, %arg1: i32) -> (i32, i32, i32) {
    %c0_i32 = arith.constant 0 : i32
    %c0_i32_0 = arith.constant 0 : i32
    %c0_i32_1 = arith.constant 0 : i32
    return %arg1, %c0_i32, %c0_i32_0 : i32, i32, i32
  }
  func.func @transform_4(%arg0: i32, %arg1: i32) -> (i32, i32, i32) {
    %c0_i32 = arith.constant 0 : i32
    %c0_i32_0 = arith.constant 0 : i32
    %c0_i32_1 = arith.constant 0 : i32
    return %arg0, %c0_i32, %c0_i32_0 : i32, i32, i32
  }
}

</mosaic_0001>

<bundles_post_ra>
// kernel: decoder_layer.3
= control target key start
LH: loop header
LB: loop body
LE: loop exit
PB: predicated region body
PF: predicated region fallthrough
CT: control target
= control target key end

     0   :  { %9 = vsyncpa [#allocation5], 0  ;;  %s918_s0 = inlined_call_operand.vmem [shape: f32[2,8,32], index: 0, kind: input, shape index: {}]   ;;  %s919_s1 = inlined_call_operand.vmem [shape: f32[1,32], index: 1, kind: input, shape index: {}]   ;;  %s920_s2 = inlined_call_operand.vmem [shape: bf16[1,32,128], index: 2, kind: input, shape index: {}]   ;;  %s921_s3 = inlined_call_operand.vmem [shape: bf16[1,64,32], index: 3, kind: input, shape index: {}]   ;;  %s922_s4 = inlined_call_operand.hbm [shape: f32[2,8,32], index: 4, kind: output, shape index: {}]  }
   0x1   :  { %11 = vsyncpa [#allocation5 + $0x1], 0  ;;  %s774_s15 = smov 0   ;;  %s776_s16 = smov 0  }
   0x2   :  { %s778_s17 = smov 0   ;;  %s780_s18 = smov 0  }
   0x3   :  { %s782_s19 = smov 0   ;;  %s784_s20 = smov 0  }
   0x4 LB: > { %s544_s21 = sadd.s32 4294967295, %s743_s20   ;;  %s545_s22 = sadd.s32 4294967294, %s743_s20   ;;  %s743_s20 = sphi %s784_s20, %s17_s20   ;;  %s739_s19 = sphi %s782_s19, %s929_s19   ;;  %s735_s18 = sphi %s780_s18, %s928_s18   ;;  %s731_s17 = sphi %s778_s17, %s927_s17   ;;  %s727_s16 = sphi %s776_s16, %s926_s16   ;;  %s723_s15 = sphi %s774_s15, %s925_s15  }
   0x5   : > { %s29_s23 = sadd.s32 1, %s739_s19  ;;  %s135_s24 = sadd.s32 1, %s731_s17 }
   0x6   : > { %p31_p0 = scmp.ge.s32.totalorder %s29_s23, 2  ;;  %p145_p1 = scmp.ne.s32.totalorder %s731_s17, %s727_s16 }
   0x7   : > { %p146_p2 = scmp.eq.s32.totalorder %s544_s21, 1  ;;  %p151_p3 = scmp.ne.s32.totalorder %s727_s16, %s723_s15 }
   0x8   : > { %s931_s23 = smov (%p31_p0, %s29_s23), 0  ;;  %p152_p5 = scmp.eq.s32.totalorder %s545_s22, 1 }
   0x9   : > { %p814_p4 = por %p146_p2, %p145_p1  ;;  %s132_s26 = ssub.s32 %s739_s19, %s931_s23 }
   0xa   : > { %p550_p6 = scmp.ge.s32.totalorder %s743_s20, 1  ;;  %p133_p7 = scmp.eq.s32.totalorder %s132_s26, 0 }
   0xb   : > { %p821_p8 = por %p152_p5, %p151_p3  ;;  %p196_p9 = scmp.lt.s32.totalorder %s743_s20, 3 }
   0xc   : > { %s827_s28 = scalar_select %p133_p7, %s731_s17, %s135_s24  }
   0xd   : > { %p197_p10 = pnand %p550_p6, %p196_p9 }
   0xe   : > { %p231_p11 = scmp.lt.s32.totalorder (!%p197_p10), %s735_s18, 1  ;;  %vm252_vm0 = vcmask (!%p197_p10), 261120   ;;  %v653_v3 = vld [vmem:[%s920_s2] sm:$0xff] (!%p197_p10)   ;;  %v745_v4 = vmov (!%p197_p10), 0.0   ;;  %v654_v5 = vld [vmem:[%s920_s2 + $0x8] sm:$0xff] (!%p197_p10)   ;;  %vm746_vm1 = vmmov (!%p197_p10), 0  }
   0xf   : > { %200 = sbr.rel (%p197_p10) target bundleno = 770 (0x302), region = 36  ;;  %575 = vmatprep.subr.bf16.mxu0 (!%p197_p10), %v745_v4  ;;  %272 = vst.msk [vmem:[#allocation3] sm:$0xff] (!%p197_p10), %vm252_vm0, %v745_v4  ;;  %583 = vmatprep.subr.bf16.mxu1 (!%p197_p10), %v745_v4  ;;  %v553_v10 = vld [vmem:[%s919_s1] ss:$0 sm:$0xff] (!%p197_p10)  ;;  %vm270_vm2 = vcmask (!%p197_p10), 257024   ;;  %v656_v16 = vld [vmem:[%s921_s3 + $0x8] sm:$0xff] (!%p197_p10)  }
  0x10   : > { %576 = vmatpush3.bf16.msra.mxu0 (!%p197_p10), %v653_v3  ;;  %579 = vmatprep.mubr.msk.bf16.mxu0 (!%p197_p10), %vm746_vm1, %v745_v4  ;;  %v655_v15 = vld [vmem:[%s921_s3] sm:$0xff] (!%p197_p10)   ;;  %v657_v17 = vld [vmem:[%s921_s3 + $0x10] sm:$0xff] (!%p197_p10)   ;;  %v658_v18 = vld [vmem:[%s921_s3 + $0x18] sm:$0xff] (!%p197_p10)   ;;  %s747_s6 = smov (!%p197_p10), 64   ;;  %vm380_vm3 = vcmask (!%p197_p10), 523264   ;;  %s564_s9 = sshll.u32 (!%p197_p10), %s735_s18, 7 }
  0x11   : > { %577 = vmatprep.subr.bf16.mxu0 (!%p197_p10), %v745_v4  ;;  %591 = vmatprep.mubr.msk.bf16.mxu1 (!%p197_p10), %vm746_vm1, %v745_v4  ;;  %s870_s14 = scalar_lea.hbm (!%p197_p10), %s922_s4, %s564_s9 }
  0x12   : > { %584 = vmatpush3.bf16.msra.mxu1 (!%p197_p10), %v655_v15 }
  0x13   : > { %585 = vmatprep.subr.bf16.mxu1 (!%p197_p10), %v745_v4 }
  0x14   : > { %578 = vmatpush3.bf16.msra.mxu0 (!%p197_p10), %v654_v5 }
  0x16   : > { %s232_s29 = scalar_select %p231_p11, %s735_s18, 1  ;;  %586 = vmatpush3.bf16.msra.mxu1 %v656_v16  ;;  %v347_v31 = vld [vmem:[#allocation3] sm:$0xff] }
  0x17   : > { %587 = vmatprep.subr.bf16.mxu1 %v745_v4  ;;  %s748_s18 = smov [#allocation4]  }
  0x18   : > { %s552_s30 = sshll.u32 %s232_s29, 3  ;;  %s669_s24 = sshll.u32 %s748_s18, 4  ;;  %s670_s24 = int_to_ptr.vmem [resolvable:$false] %s669_s24 }
  0x19   : > { %s234_s7 = scalar_lea.vmem %s918_s0, %s552_s30  ;;  %s671_s26 = scalar_lea.vmem %s670_s24, 256 }
  0x1a   : > { %v834_v0 = vld [vmem:[%s234_s7] sm:$0xff]  ;;  %588 = vmatpush3.bf16.msra.mxu1 %v657_v17  ;;  %s228_s7 = sand.u32 1, %s727_s16  }
  0x1b   : > { %v251_v1 = vmul.f32 %v834_v0, %v834_v0  ;;  %589 = vmatprep.subr.bf16.mxu1 %v745_v4  ;;  %s551_s8 = sshll.u32 %s228_s7, 3  ;;  %s434_s21 = scalar_lea.sflag [#allocation5], %s228_s7 }
  0x1c   : > { %s230_s10 = scalar_lea.vmem [#allocation4], %s551_s8 }
  0x1d   : > { %v253_v2 = vsel %vm252_vm0, %v251_v1, 0.0  ;;  %s447_s11 = sshll.u32 %s230_s10, 4  ;;  %s872_s11 = int_to_ptr.vmem [resolvable:$true] %s447_s11 }
  0x1e   : > { %254 = vadd.xlane.f32.xlu0 %v253_v2  ;;  %590 = vmatpush3.bf16.msra.mxu1 %v658_v18  ;;  %s665_s22 = scalar_lea.vmem %s872_s11, 128  ;;  %p672_p1 = scmp.lt.s32.totalorder %s872_s11, %s670_s24 }
  0x1f   : > { %p666_p12 = scmp.ne.s32.totalorder %s872_s11, %s665_s22  ;;  %p673_p2 = scmp.lt.s32.totalorder %s671_s26, %s665_s22 }
  0x21   : > { %p667_p13 = pnand %p666_p12, %p814_p4  ;;  %p674_p3 = por %p673_p2, %p672_p1 }
  0x23   : > { %p668_p0 = pneg %p667_p13 }
  0x25   : > { %p675_p5 = pnand %p674_p3, %p668_p0 }
  0xab   : > { %v255_v6 = vpop.xlane.xlu0 %254 }
  0xac   : > { %v257_v7 = vmul.f32 0.03125, %v255_v6 }
  0xae   : > { %v258_v8 = vadd.f32 1e-06, %v257_v7 }
  0xb0   : > { %659 = vrsqrt.f32 %v258_v8 }
  0xba   : > { %v660_v9 = vpop.eup %659 }
  0xbb   : > { %v260_v11 = vmul.f32 %v660_v9, %v834_v0 }
  0xbd   : > { %v268_v12 = vmul.f32 %v553_v10, %v260_v11 }
  0xbf   : > { %v269_v13 = vpack.c.bf16 %v268_v12, %v268_v12 }
  0xc1   : > { %271 = vst.msk [vmem:[#allocation2] sm:$0xf] %vm270_vm2, %v269_v13 }
  0xc8   : > { %v273_v14 = vld [vmem:[#allocation2] sm:$0xf] }
  0xc9   : > { %580 = vmatmul.mubr.msk.bf16.vlgmr.msra.gmra.mrb[0].mxu0 %vm252_vm0, %v273_v14 }
 0x19c   : > { %v328_v19 = vpop.f32.mrb[0].mxu0 }
 0x19d   : > { %342 = vrot.lane.b32.xlu0 %v328_v19, %s747_s6  ;;  %v581_v20 = vpop.f32.mrb[1].mxu0  ;;  %v557_v23 = vmul.f32 -1.442695, %v328_v19 }
 0x19e   : > { %v331_v21 = vpop.f32.mrb[2].mxu0 }
 0x19f   : > { %v582_v22 = vpop.f32.mrb[3].mxu0  ;;  %661 = vpow2.f32 %v557_v23 }
 0x1a9   : > { %v662_v24 = vpop.eup %661 }
 0x1aa   : > { %v337_v25 = vadd.f32 1.0, %v662_v24 }
 0x1ac   : > { %663 = vrcp.f32 %v337_v25 }
 0x1b6   : > { %v664_v26 = vpop.eup %663 }
 0x1b7   : > { %v340_v27 = vmul.f32 %v664_v26, %v328_v19 }
 0x20f   : > { %v343_v28 = vpop.permute.xlu0 %342 }
 0x210   : > { %v345_v29 = vmul.f32 %v343_v28, %v340_v27 }
 0x212   : > { %v346_v30 = vpack.c.bf16 %v345_v29, %v345_v29 }
 0x214   : > { %592 = vmatmul.mubr.msk.bf16.vlgmr.msra.gmra.mrb[0].mxu1 %vm380_vm3, %v346_v30 }
 0x2e7   : > { %v418_v32 = vpop.f32.mrb[0].mxu1 }
 0x2e8   : > { %v424_v33 = vadd.f32 %v418_v32, %v347_v31  ;;  %v593_v34 = vpop.f32.mrb[1].mxu1 }
 0x2e9   : > { %v421_v35 = vpop.f32.mrb[2].mxu1 }
 0x2ea   : > { %425 = vst.msk [vmem:[#allocation3] sm:$0xff] %vm252_vm0, %v424_v33  ;;  %v594_v36 = vpop.f32.mrb[3].mxu1 }
 0x2f1   : > { %v430_v37 = vld [vmem:[#allocation3] sm:$0xff] }
 0x2f2   : > { %v431_v38 = vadd.f32 %v430_v37, %v834_v0 }
 0x2f4   : > { %432 = vst.msk [vmem:[%s230_s10] sm:$0xff] %vm252_vm0, %v431_v38 }
 0x2f5   : > { %678 = shalt.err (!%p675_p5)
}
 0x2f6   : > { %s679_s29 = scalar_lea.hbm %s870_s14, 128  ;;  %s683_s6 = scalar_lea.hbm %s922_s4, 256 }
 0x2f7   : > { %p680_p6 = scmp.ne.s32.totalorder %s870_s14, %s679_s29  ;;  %p684_p10 = scmp.lt.u32.totalorder %s870_s14, %s922_s4 }
 0x2f8   : > { %p685_p11 = scmp.lt.u32.totalorder %s683_s6, %s679_s29  ;;  %p687_p13 = scmp.lt.u32.totalorder %s679_s29, %s870_s14 }
 0x2f9   : > { %p681_p7 = pnand %p680_p6, %p814_p4 }
 0x2fa   : > { %p686_p12 = por %p685_p11, %p684_p10 }
 0x2fb   : > { %p682_p9 = pneg %p681_p7 }
 0x2fc   : > { %p688_p0 = por %p687_p13, %p686_p12 }
 0x2fe   : > { %p689_p1 = pnand %p688_p0, %p682_p9 }
 0x300   : > { %692 = shalt.err (!%p689_p1)
}
 0x301   : > { %595 = dma.vmem_to_hbm [thread:$0]  (%p814_p4), %s872_s11, 128, %s870_s14, %s434_s21  }
 0x302 PF: > { %p601_p2 = scmp.ge.s32.totalorder %s743_s20, 2  ;;  %s459_s9 = sand.u32 1, %s723_s15  }
 0x303   : > { %s460_s10 = scalar_lea.sflag [#allocation5], %s459_s9 }
 0x304   : > { %p598_p3 = pnand %p601_p2, %p821_p8 }
 0x306   : > { %718 = dma.done.wait (!%p598_p3), %s460_s10, 128  }
 0x307   : > { %720 = vsyncadd (!%p598_p3), %s460_s10, 4294967168  ;;  %s17_s20 = sadd.s32 1, %s743_s20   ;;  %s925_s15 = smov %s727_s16 }
 0x308   : > { %p14_p5 = scmp.ge.s32.totalorder %s17_s20, 4   ;;  %s926_s16 = smov %s731_s17 }
 0x309   : > { %s927_s17 = smov %s827_s28  ;;  %s928_s18 = smov %s739_s19 }
 0x30a   : > { %s929_s19 = smov %s931_s23  ;;  %16 = sbr.rel (!%p14_p5) target bundleno = 4 (0x4), region = 85 }
 0x311   :  { %465 = vsyncpa [#allocation5], 1 }
 0x312   :  { %467 = vsyncpa [#allocation5 + $0x1], 1 }

// kernel: decoder_layer.2
= control target key start
LH: loop header
LB: loop body
LE: loop exit
PB: predicated region body
PF: predicated region fallthrough
CT: control target
= control target key end

     0   :  { %s1098_s21 = smov 0   ;;  %s1100_s22 = smov 0   ;;  %s1228_s0 = inlined_call_operand.vmem [shape: f32[2,8,32], index: 0, kind: input, shape index: {}]   ;;  %s1229_s1 = inlined_call_operand.vmem [shape: f32[2,8,8], index: 1, kind: input, shape index: {}]   ;;  %s1230_s2 = inlined_call_operand.vmem [shape: f32[2,8,8], index: 2, kind: input, shape index: {}]   ;;  %s1231_s3 = inlined_call_operand.vmem [shape: bf16[4,32,24], index: 3, kind: input, shape index: {}]   ;;  %s1232_s4 = inlined_call_operand.vmem [shape: bf16[4,8,32], index: 4, kind: input, shape index: {}]   ;;  %s1233_s5 = inlined_call_operand.vmem [shape: f32[1,32], index: 5, kind: input, shape index: {}]   ;;  %s1234_s6 = inlined_call_operand.vmem [shape: f32[2,8,32], index: 6, kind: output, shape index: {}]  }
   0x1   :  { %1235 = sst [smem:[#allocation4_spill]] %s1228_s0  ;;  %s1102_s23 = smov 0  }
   0x2   :  { %s1104_s24 = smov 0   ;;  %s1106_s25 = smov 0  }
   0x3 LB: > { %s25_s26 = sadd.s32 1, %s1046_s23  ;;  %s28_s27 = sadd.s32 1, %s1050_s24  ;;  %s1054_s25 = sphi %s1106_s25, %s16_s25   ;;  %s1050_s24 = sphi %s1104_s24, %s1240_s24   ;;  %s1046_s23 = sphi %s1102_s23, %s1239_s23   ;;  %s1042_s22 = sphi %s1100_s22, %s1238_s22   ;;  %s1038_s21 = sphi %s1098_s21, %s1237_s21  }
   0x4   : > { %p26_p0 = scmp.ge.s32.totalorder %s25_s26, 4  ;;  %p886_p1 = scmp.ge.s32.totalorder %s1054_s25, 1 }
   0x5   : > { %p260_p2 = scmp.lt.s32.totalorder %s1054_s25, 9 }
   0x6   : > { %s1242_s26 = smov (%p26_p0, %s25_s26), 0  ;;  %s1244_s27 = smov (!%p26_p0, %s28_s27), %s1050_s24 }
   0x7   : > { %p261_p3 = pnand %p886_p1, %p260_p2  ;;  %p30_p4 = scmp.ge.s32.totalorder %s1244_s27, 2 }
   0x8   : > { %p305_p5 = scmp.lt.s32.totalorder (!%p261_p3), %s1042_s22, 1  ;;  %p317_p6 = scmp.lt.s32.totalorder (!%p261_p3), %s1038_s21, 3 }
   0x9   : > { %s1246_s27 = smov (%p30_p4, %s1244_s27), 0  ;;  %264 = sbr.rel (%p261_p3) target bundleno = 1948 (0x79c), region = 44 }
   0xa   : > { %s1236_s0 = sld [smem:[#allocation4_spill]] (!%p261_p3)  ;;  %p894_p7 = scmp.ne.s32.totalorder (!%p261_p3), %s1038_s21, 0 }
  0x10   : > { %s1248_s22 = smov (!%p305_p5, %s1042_s22), 1  ;;  %334 = sbr.rel (%p894_p7) target bundleno = 188 (0xbc), region = 48 }
  0x11   : > { %s318_s28 = scalar_select %p317_p6, %s1038_s21, 3 }
  0x12   : > { %s1132_s29 = sshll.u32 %s1248_s22, 3  ;;  %vm337_vm0 = vcmask (!%p894_p7), 261120   ;;  %v1056_v2 = vmov (!%p894_p7), 0.0   ;;  %v895_v8 = vld [vmem:[%s1233_s5] ss:$0 sm:$0xff] (!%p894_p7)  ;;  %vm355_vm1 = vcmask (!%p894_p7), 257024  }
  0x13   : > { %s1138_s8 = scalar_lea.vmem %s1236_s0, %s1132_s29  ;;  %s312_s11 = scalar_lea.vmem %s1229_s1, %s1132_s29  ;;  %357 = vst.msk [vmem:[#allocation3] sm:$0xff] (!%p894_p7), %vm337_vm0, %v1056_v2 }
  0x14   : > { %s316_s14 = scalar_lea.vmem %s1230_s2, %s1132_s29  ;;  %s911_s15 = sshll.u32 %s318_s28, 4  ;;  %v335_v0 = vld [vmem:[%s1138_s8] sm:$0xff] (!%p894_p7) }
  0x15   : > { %s321_s18 = scalar_lea.vmem %s1231_s3, %s911_s15  ;;  %s892_s19 = sshll.u32 %s318_s28, 2  ;;  %v336_v1 = vmul.f32 (!%p894_p7), %v335_v0, %v335_v0 }
  0x16   : > { %s1154_s30 = scalar_lea.vmem %s1232_s4, %s892_s19  ;;  %s329_s9 = scalar_lea.vmem %s1234_s6, %s1132_s29 }
  0x17   : > { %v338_v3 = vsel %vm337_vm0, %v336_v1, 0.0 }
  0x18   : > { %339 = vadd.xlane.f32.xlu0 %v338_v3 }
  0xa5   : > { %v340_v4 = vpop.xlane.xlu0 %339 }
  0xa6   : > { %v342_v5 = vmul.f32 0.03125, %v340_v4 }
  0xa8   : > { %v343_v6 = vadd.f32 1e-06, %v342_v5 }
  0xaa   : > { %1008 = vrsqrt.f32 %v343_v6 }
  0xb4   : > { %v1009_v7 = vpop.eup %1008 }
  0xb5   : > { %v345_v9 = vmul.f32 %v1009_v7, %v335_v0 }
  0xb7   : > { %v353_v10 = vmul.f32 %v895_v8, %v345_v9 }
  0xb9   : > { %v354_v11 = vpack.c.bf16 %v353_v10, %v353_v10 }
  0xbb   : > { %356 = vst.msk [vmem:[#allocation2] sm:$0xf] %vm355_vm1, %v354_v11 }
  0xbc PF: > { %v1010_v12 = vld [vmem:[%s321_s18] sm:$0xff]   ;;  %v1057_v13 = vmov 0.0   ;;  %v1011_v14 = vld [vmem:[%s321_s18 + $0x8] sm:$0xff]   ;;  %vm1058_vm2 = vmmov 0   ;;  %vm375_vm3 = vcmask 261120   ;;  %v422_v16 = vlaneseq  ;;  %s1060_s13 = smov 120  }
  0xbd   : > { %925 = vmatprep.subr.bf16.mxu0 %v1057_v13  ;;  %938 = vmatprep.subr.mxu1 %v1057_v13  ;;  %v1059_v22 = vmov 1.0   ;;  %vm434_vm6 = vcmask 64512   ;;  %v420_v23 = vld [vmem:[%s312_s11] sm:$0xff]  ;;  %s1061_s15 = smov 8   ;;  %vm667_vm8 = vcmask 1043456   ;;  %p908_p8 = scmp.ne.s32.totalorder %s1038_s21, 3 }
  0xbe   : > { %926 = vmatpush3.bf16.msra.mxu0 %v1010_v12  ;;  %929 = vmatprep.mubr.msk.bf16.mxu0 %vm1058_vm2, %v1057_v13  ;;  %v425_v17 = vand.u32 127, %v422_v16  ;;  %v423_v20 = vshrl.u32 %v422_v16, 7  ;;  %v421_v30 = vld [vmem:[%s316_s14] sm:$0xff]  ;;  %s1062_s14 = smov 112  }
  0xbf   : > { %927 = vmatprep.subr.bf16.mxu0 %v1057_v13  ;;  %940 = vmatprep.mubr.msk.f32.mxu1 %vm1058_vm2, %v1057_v13  ;;  %v713_v53 = vld [vmem:[%s1154_s30] sm:$0xf]  ;;  %v712_v8 = vld [vmem:[#allocation3] sm:$0xff] }
  0xc0   : > { %v427_v18 = vadd.s32 4, %v425_v17  ;;  %v899_v19 = vadd.s32 4294967292, %v425_v17  ;;  %vm426_vm4 = vcmp.lt.s32.totalorder %v425_v17, 4  ;;  %vm647_vm7 = vcmp.gt.s32.totalorder %v425_v17, %v423_v20 }
  0xc1   : > { %v718_v54 = vsel %vm667_vm8, %v713_v53, 0 }
  0xc2   : > { %928 = vmatpush3.bf16.msra.mxu0 %v1011_v14  ;;  %v358_v15 = vld [vmem:[#allocation2] sm:$0xf]  ;;  %v429_v21 = vsel %vm426_vm4, %v427_v18, %v899_v19 }
  0xc3   : > { %933 = vmatprep.subr.mxu0 %v1057_v13  ;;  %vm430_vm5 = vcmp.eq.s32.totalorder %v423_v20, %v429_v21  ;;  %v766_v14 = vld [vmem:[%s1138_s8] sm:$0xff] (!%p908_p8) }
  0xc4   : > { %939 = vmatpush3.msk.msra.mxu1 %vm430_vm5, %v1059_v22 }
  0xc5   : > { %930 = vmatmul.mubr.msk.bf16.vlgmr.msra.gmra.mrb[0].mxu0 %vm375_vm3, %v358_v15  ;;  %943 = vmatprep.subr.bf16.mxu1 %v1057_v13 }
  0xc6   : > { %935 = vmatprep.mubr.msk.f32.mxu0 %vm1058_vm2, %v1057_v13  ;;  %934 = vmatpush3.msk.msra.mxu0 %vm430_vm5, %v1059_v22 }
  0xc7   : > { %949 = vmatprep.subr.bf16.mxu0 %v1057_v13 }
 0x198   : > { %v413_v24 = vpop.f32.mrb[0].mxu0 }
 0x199   : > { %517 = vrot.lane.b32.xlu0 %v413_v24, %s1060_s13  ;;  %v931_v25 = vpop.f32.mrb[1].mxu0  ;;  %936 = vmatmul.mubr.msk.f32.vlgmr.msra.gmra.mrb[4].mxu0 %vm434_vm6, %v413_v24  ;;  %v433_v26 = vmul.f32 %v420_v23, %v413_v24  ;;  %v419_v55 = vpack.c.bf16 %v413_v24, %v413_v24 }
 0x19a   : > { %v416_v27 = vpop.f32.mrb[2].mxu0  ;;  %951 = vmatprep.mubr.msk.bf16.mxu0 %vm1058_vm2, %v1057_v13 }
 0x19b   : > { %v932_v28 = vpop.f32.mrb[3].mxu0 }
 0x19d   : > { %513 = vrot.lane.b32.xlu0 %v420_v23, %s1061_s15 }
 0x20b   : > { %v518_v29 = vpop.permute.xlu0 %517 }
 0x20c   : > { %941 = vmatmul.mubr.msk.f32.vlgmr.msra.gmra.mrb[0].mxu1 %vm434_vm6, %v518_v29 }
 0x20d   : > { %945 = vmatprep.mubr.msk.bf16.mxu1 %vm1058_vm2, %v1057_v13 }
 0x20f   : > { %v514_v38 = vpop.permute.xlu0 %513 }
 0x210   : > { %v516_v39 = vmul.f32 %v514_v38, %v413_v24 }
 0x26c   : > { %v504_v31 = vpop.f32.mrb[4].mxu0 }
 0x26d   : > { %v508_v32 = vmul.f32 %v504_v31, %v421_v30  ;;  %v937_v33 = vpop.f32.mrb[5].mxu0 }
 0x26f   : > { %v509_v34 = vadd.f32 %v508_v32, %v433_v26 }
 0x271   : > { %v510_v45 = vmul.f32 0.35355338, %v509_v34 }
 0x273   : > { %v511_v46 = vpack.c.bf16 %v510_v45, %v510_v45 }
 0x2df   : > { %v587_v35 = vpop.f32.mrb[0].mxu1 }
 0x2e0   : > { %v591_v36 = vmul.f32 %v587_v35, %v421_v30  ;;  %v942_v37 = vpop.f32.mrb[1].mxu1 }
 0x2e2   : > { %593 = vrot.lane.b32.xlu1 %v591_v36, %s1061_s15 }
 0x354   : > { %v594_v40 = vpop.permute.xlu1 %593 }
 0x355   : > { %v596_v41 = vadd.f32 %v594_v40, %v516_v39 }
 0x357   : > { %v597_v42 = vpack.c.bf16 %v596_v41, %v596_v41 }
 0x359   : > { %599 = vrot.lane.b32.xlu1 %v597_v42, %s1060_s13 }
 0x3cb   : > { %v600_v43 = vpop.permute.xlu1 %599 }
 0x3cc   : > { %v605_v44 = vsel %vm434_vm6, %v600_v43, 0 }
 0x3cd   : > { %944 = vmatpush3.bf16.xpose.msra.mxu1 %v605_v44 }
 0x3ce   : > { %955 = vmatprep.subr.bf16.mxu1 %v1057_v13 }
 0x3d4   : > { %946 = vmatmul.mubr.msk.bf16.vlgmr.msra.gmra.mrb[4].mxu1 %vm434_vm6, %v511_v46 }
 0x3d5   : > { %957 = vmatprep.mubr.msk.bf16.mxu1 %vm1058_vm2, %v1057_v13  ;;  %956 = vmatpush3.bf16.msra.mxu1 %v718_v54 }
 0x4a7   : > { %v641_v47 = vpop.f32.mrb[4].mxu1 }
 0x4a8   : > { %v648_v48 = vsel %vm647_vm7, -10000.0, %v641_v47  ;;  %v947_v49 = vpop.f32.mrb[5].mxu1 }
 0x4a9   : > { %v644_v50 = vpop.f32.mrb[6].mxu1  ;;  %v649_v51 = vsel %vm434_vm6, %v648_v48, -inf }
 0x4aa   : > { %650 = vmax.xlane.f32.xlu0 %v649_v51  ;;  %v948_v52 = vpop.f32.mrb[7].mxu1 }
 0x4c0   : > { %662 = vrot.lane.b32.xlu0 %v419_v55, %s1062_s14 }
 0x537   : > { %v651_v56 = vpop.xlane.xlu0 %650 }
 0x538   : > { %v652_v57 = vsub.f32 %v648_v48, %v651_v56 }
 0x53a   : > { %v653_v58 = vmul.f32 1.442695, %v652_v57 }
 0x53b   : > { %v663_v59 = vpop.permute.xlu0 %662 }
 0x53c   : > { %1012 = vpow2.f32 %v653_v58  ;;  %v669_v60 = vsel %vm667_vm8, %v663_v59, 0 }
 0x53d   : > { %950 = vmatpush3.bf16.msra.mxu0 %v669_v60 }
 0x546   : > { %v1013_v61 = vpop.eup %1012 }
 0x547   : > { %v655_v62 = vsel %vm434_vm6, %v1013_v61, 0.0 }
 0x548   : > { %656 = vadd.xlane.f32.xlu1 %v655_v62 }
 0x5d5   : > { %v657_v63 = vpop.xlane.xlu1 %656 }
 0x5d6   : > { %1014 = vrcp.f32 %v657_v63 }
 0x5e0   : > { %v1015_v0 = vpop.eup %1014 }
 0x5e1   : > { %v659_v1 = vmul.f32 %v1015_v0, %v1013_v61 }
 0x5e3   : > { %v660_v2 = vpack.c.bf16 %v659_v1, %v659_v1 }
 0x5e5   : > { %952 = vmatmul.mubr.msk.bf16.vlgmr.msra.gmra.mrb[8].mxu0 %vm434_vm6, %v660_v2 }
 0x6b8   : > { %v705_v3 = vpop.f32.mrb[8].mxu0 }
 0x6b9   : > { %v711_v4 = vpack.c.bf16 %v705_v3, %v705_v3  ;;  %v953_v5 = vpop.f32.mrb[9].mxu0 }
 0x6ba   : > { %v708_v6 = vpop.f32.mrb[10].mxu0 }
 0x6bb   : > { %v954_v7 = vpop.f32.mrb[11].mxu0  ;;  %958 = vmatmul.mubr.msk.bf16.vlgmr.msra.gmra.mrb[8].mxu1 %vm434_vm6, %v711_v4 }
 0x78b   : > { %765 = sbr.rel (%p908_p8) target bundleno = 1948 (0x79c), region = 52 }
 0x78e   : > { %v754_v9 = vpop.f32.mrb[8].mxu1 }
 0x78f   : > { %v760_v10 = vadd.f32 %v754_v9, %v712_v8  ;;  %v959_v11 = vpop.f32.mrb[9].mxu1 }
 0x790   : > { %v757_v12 = vpop.f32.mrb[10].mxu1 }
 0x791   : > { %761 = vst.msk [vmem:[#allocation3] sm:$0xff] %vm375_vm3, %v760_v10  ;;  %v960_v13 = vpop.f32.mrb[11].mxu1 }
 0x798   : > { %v767_v15 = vld [vmem:[#allocation3] sm:$0xff] }
 0x799   : > { %v768_v16 = vadd.f32 %v767_v15, %v766_v14 }
 0x79b   : > { %769 = vst.msk [vmem:[%s329_s9] sm:$0xff] %vm375_vm3, %v768_v16 }
 0x79c PF: > { %s16_s25 = sadd.s32 1, %s1054_s25   ;;  %s1237_s21 = smov %s1046_s23 }
 0x79d   : > { %p13_p9 = scmp.ge.s32.totalorder %s16_s25, 10   ;;  %s1238_s22 = smov %s1050_s24 }
 0x79e   : > { %s1239_s23 = smov %s1242_s26  ;;  %s1240_s24 = smov %s1246_s27 }
 0x79f   :  { %15 = sbr.rel (!%p13_p9) target bundleno = 3 (0x3), region = 94 }

</bundles_post_ra>
